<compile_context>
chip_gen: v6e
topology: v6e:2x2x1
jax: 0.10.0
libtpu: 0.0.40
codegen_flags: <defaults>
</compile_context>

<pallas_src>
import functools

import jax
import jax.numpy as jnp
from jax import lax
from jax.experimental import pallas as pl
from jax.experimental.pallas import tpu as pltpu

# Conservative VMEM budgets (bytes): safe on v7x (64 MiB physical); v5e/v6e share them.
_FUSED_BUDGET = 24 << 20   # fused path resident ~= 4 * C * HW * esize
_PASS2_BUDGET = 24 << 20   # apply pass resident ~= 4 * C * tile * esize (in + out, 2x buf)
_PASS1_BUDGET = 32 << 20   # gate pass resident ~= 2 * C * tile * esize (input only)
_VMEM_LIMIT = 48 << 20


def _left_rows(kernel_size):
    pad = (kernel_size - 1) // 2
    return max(8, ((pad + 7) // 8) * 8)   # sublane-aligned left zero region


def _channel_conv_sigmoid(sums_col, w_ref, pad_ref, kernel_size):
    """sigmoid(Conv1d over the channel axis) of per-channel sums (1/HW folded into taps).

    sums_col: (C, 1) f32.  pad_ref: (left + C + pad, 1) f32 VMEM staging buffer.
    Implemented as k shifted FMAs on slices of the zero-padded sums: no CxC band,
    no MXU matvec, O(C*k) work total (epilogue only).
    """
    C = sums_col.shape[0]
    pad = (kernel_size - 1) // 2
    left = _left_rows(kernel_size)
    pad_ref[...] = jnp.zeros_like(pad_ref)
    pad_ref[left:left + C, :] = sums_col           # aligned store into the staging buffer
    pre = jnp.zeros((C, 1), jnp.float32)
    for j in range(kernel_size):                   # k is tiny & static: unrolled
        off = left + j - pad
        pre = pre + w_ref[j] * pad_ref[off:off + C, :]
    return jax.nn.sigmoid(pre)


def _fused_kernel(x_ref, w_ref, out_ref, pad_ref, *, kernel_size):
    # One batch element fully resident: mean -> channel conv -> sigmoid -> apply gate.
    # x_ref/out_ref: (1, C, HW); w_ref: (k,) SMEM taps (pre-scaled by 1/HW).
    x = x_ref[0]
    sums = jnp.sum(x.astype(jnp.float32), axis=-1, keepdims=True)        # (C, 1)
    gate = _channel_conv_sigmoid(sums, w_ref, pad_ref, kernel_size)      # (C, 1)
    out_ref[0] = (x * gate.astype(x.dtype)).astype(out_ref.dtype)


def _gate_kernel(x_ref, w_ref, gate_ref, acc_ref, pad_ref, *, kernel_size, hw, tile):
    # Pass 1: accumulate per-channel spatial sums over HW tiles; finalize at last tile.
    # x_ref: (1, C, tile); gate_ref: (1, C, 1); acc_ref: (C, 1) f32 scratch.
    t = pl.program_id(1)

    @pl.when(t == 0)
    def _():
        acc_ref[...] = jnp.zeros_like(acc_ref)

    x = x_ref[0].astype(jnp.float32)
    if hw % tile != 0:   # static: mask the ragged last tile (out-of-bounds lanes undefined)
        lane = lax.broadcasted_iota(jnp.int32, x.shape, 1)
        x = jnp.where(t * tile + lane < hw, x, 0.0)
    acc_ref[...] += jnp.sum(x, axis=-1, keepdims=True)

    @pl.when(t == pl.num_programs(1) - 1)
    def _():
        gate = _channel_conv_sigmoid(acc_ref[...], w_ref, pad_ref, kernel_size)
        gate_ref[0] = gate.astype(gate_ref.dtype)


def _apply_kernel(gate_ref, x_ref, out_ref):
    # Pass 2: out = x * gate (per-channel broadcast); lane-dense full-block stores.
    x = x_ref[0]
    out_ref[0] = (x * gate_ref[0].astype(x.dtype)).astype(out_ref.dtype)


def _pick_tile(hw, bytes_per_lane, budget):
    """Largest lane tile (multiple of 128) whose resident VMEM fits `budget`."""
    max_tile = max(128, (budget // max(bytes_per_lane, 1)) // 128 * 128)
    if hw <= max_tile:
        return hw
    t = max_tile                        # prefer a divisor of hw (no ragged last tile)
    while t >= max(128, max_tile // 2):
        if hw % t == 0:
            return t
        t -= 128
    return max_tile                     # ragged last tile handled by masking


def neighbor_fusion(x_nchw, conv_w, *, kernel_size=3,
                    fused_budget_bytes=_FUSED_BUDGET,
                    pass1_budget_bytes=_PASS1_BUDGET,
                    pass2_budget_bytes=_PASS2_BUDGET):
    """x_nchw: [B, C, H, W]; conv_w: [kernel_size] -> [B, C, H, W]."""
    if kernel_size % 2 != 1:
        raise ValueError("even kernel_size needs asymmetric padding; unsupported")
    B, C, H, W = x_nchw.shape
    HW = H * W
    x = x_nchw.reshape(B, C, HW)        # zero-cost: keeps NCHW order, HW on the lane axis
    esize = jnp.dtype(x.dtype).itemsize
    pad = (kernel_size - 1) // 2
    w_scaled = conv_w.astype(jnp.float32) * (1.0 / HW)   # fold mean's 1/HW into the taps
    pad_buf = pltpu.VMEM((_left_rows(kernel_size) + C + pad, 1), jnp.float32)

    # --- Fused single pass: one batch slab resident -> 1 read + 1 write of x. ---
    if 4 * C * HW * esize <= fused_budget_bytes:
        out = pl.pallas_call(
            functools.partial(_fused_kernel, kernel_size=kernel_size),
            out_shape=jax.ShapeDtypeStruct((B, C, HW), x.dtype),
            grid_spec=pltpu.PrefetchScalarGridSpec(
                num_scalar_prefetch=0,
                grid=(B,),
                in_specs=[pl.BlockSpec((1, C, HW), lambda b: (b, 0, 0)),
                          pl.BlockSpec(memory_space=pltpu.MemorySpace.SMEM)],
                out_specs=pl.BlockSpec((1, C, HW), lambda b: (b, 0, 0)),
                scratch_shapes=[pad_buf]),
            compiler_params=pltpu.CompilerParams(
                dimension_semantics=("parallel",),
                vmem_limit_bytes=_VMEM_LIMIT),
        )(x, w_scaled)
        return out.reshape(B, C, H, W)

    # --- Two-pass path for large C*HW: gate (reduction) then apply (streaming). ---
    tile1 = _pick_tile(HW, 2 * C * esize, pass1_budget_bytes)   # input-only pass
    tile2 = _pick_tile(HW, 4 * C * esize, pass2_budget_bytes)   # input + output pass

    gate = pl.pallas_call(
        functools.partial(_gate_kernel, kernel_size=kernel_size, hw=HW, tile=tile1),
        out_shape=jax.ShapeDtypeStruct((B, C, 1), jnp.float32),
        grid_spec=pltpu.PrefetchScalarGridSpec(
            num_scalar_prefetch=0,
            grid=(B, pl.cdiv(HW, tile1)),
            in_specs=[pl.BlockSpec((1, C, tile1), lambda b, t: (b, 0, t)),
                      pl.BlockSpec(memory_space=pltpu.MemorySpace.SMEM)],
            out_specs=pl.BlockSpec((1, C, 1), lambda b, t: (b, 0, 0)),
            scratch_shapes=[pltpu.VMEM((C, 1), jnp.float32), pad_buf]),
        compiler_params=pltpu.CompilerParams(
            dimension_semantics=("parallel", "arbitrary"),
            vmem_limit_bytes=_VMEM_LIMIT),
    )(x, w_scaled)

    out = pl.pallas_call(
        _apply_kernel,
        out_shape=jax.ShapeDtypeStruct((B, C, HW), x.dtype),
        grid_spec=pltpu.PrefetchScalarGridSpec(
            num_scalar_prefetch=0,
            grid=(B, pl.cdiv(HW, tile2)),
            in_specs=[pl.BlockSpec((1, C, 1), lambda b, t: (b, 0, 0)),
                      pl.BlockSpec((1, C, tile2), lambda b, t: (b, 0, t))],
            out_specs=pl.BlockSpec((1, C, tile2), lambda b, t: (b, 0, t))),
        compiler_params=pltpu.CompilerParams(
            dimension_semantics=("parallel", "parallel"),
            vmem_limit_bytes=_VMEM_LIMIT),
    )(gate, x)

    return out.reshape(B, C, H, W)


def ref_forward(x_nchw, conv_w, kernel_size=3):
    """Pure-JAX reference of the PyTorch NeighborFusion forward (NCHW)."""
    B, C, H, W = x_nchw.shape
    pad = (kernel_size - 1) // 2
    y = jnp.mean(x_nchw, axis=(2, 3))                     # [B, C]
    yp = jnp.pad(y, ((0, 0), (pad, pad)))
    pre = sum(conv_w[j] * yp[:, j:j + C] for j in range(kernel_size))
    gate = jax.nn.sigmoid(pre)                            # [B, C]
    return x_nchw * gate[:, :, None, None]


if __name__ == "__main__":
    key = jax.random.PRNGKey(0)
    kx, kw, kw5 = jax.random.split(key, 3)

    # Main check: fused single-pass path (default dispatch), kernel_size=3.
    B, C, H, W, K = 2, 4, 16, 16, 3
    x = jax.random.normal(kx, (B, C, H, W), jnp.float32)
    conv_w = jax.random.normal(kw, (K,), jnp.float32) * 0.5

    out = jax.block_until_ready(neighbor_fusion(x, conv_w, kernel_size=K))
    ref = ref_forward(x, conv_w, K)
    assert out.shape == (B, C, H, W), out.shape
    assert jnp.allclose(out, ref, atol=1e-5, rtol=1e-5), float(jnp.max(jnp.abs(out - ref)))

    # Exercise the tiled two-pass path (ragged HW, masked last tile) by shrinking the
    # VMEM budgets; small shape keeps the test cheap.
    x2 = jax.random.normal(kx, (2, 4, 20, 20), jnp.float32)
    out2 = jax.block_until_ready(
        neighbor_fusion(x2, conv_w, kernel_size=K,
                        fused_budget_bytes=0, pass1_budget_bytes=1, pass2_budget_bytes=1))
    ref2 = ref_forward(x2, conv_w, K)
    assert jnp.allclose(out2, ref2, atol=1e-5, rtol=1e-5), float(jnp.max(jnp.abs(out2 - ref2)))

    # kernel_size=5 sanity check (channel-conv edge handling).
    conv_w5 = jax.random.normal(kw5, (5,), jnp.float32) * 0.5
    out5 = jax.block_until_ready(neighbor_fusion(x, conv_w5, kernel_size=5))
    ref5 = ref_forward(x, conv_w5, 5)
    assert jnp.allclose(out5, ref5, atol=1e-5, rtol=1e-5), float(jnp.max(jnp.abs(out5 - ref5)))

    print("KERNEL_OK")
</pallas_src>

<mosaic_0001>
module attributes {stable_mosaic.version = 11 : i64} {
  func.func @_fused_kernel(%arg0: i32, %arg1: memref<1x4x256xf32, #tpu.memory_space<vmem>>, %arg2: memref<3xf32, #tpu.memory_space<smem>>, %arg3: memref<1x4x256xf32, #tpu.memory_space<vmem>>, %arg4: memref<13x1xf32, #tpu.memory_space<vmem>>) attributes {dimension_semantics = [#tpu.dimension_semantics<parallel>], iteration_bounds = array<i64: 2>, scalar_prefetch = 0 : i64, scratch_operands = 1 : i64, tpu.core_type = #tpu.core_type<tc>, window_params = [{transform_indices = @transform_0, window_bounds = array<i64: 1, 4, 256>}, {transform_indices = @transform_1, window_bounds = array<i64: 3>}, {transform_indices = @transform_2, window_bounds = array<i64: 1, 4, 256>}]} {
    %c0 = arith.constant 0 : index
    %c0_0 = arith.constant 0 : index
    %c0_1 = arith.constant 0 : index
    %0 = vector.load %arg1[%c0, %c0_0, %c0_1] : memref<1x4x256xf32, #tpu.memory_space<vmem>>, vector<1x4x256xf32>
    %1 = vector.shape_cast %0 : vector<1x4x256xf32> to vector<4x256xf32>
    %cst = arith.constant dense<0.000000e+00> : vector<4xf32>
    %2 = vector.multi_reduction <add>, %1, %cst [1] : vector<4x256xf32> to vector<4xf32>
    %3 = vector.shape_cast %2 : vector<4xf32> to vector<4x1xf32>
    %cst_2 = arith.constant 0.000000e+00 : f32
    %4 = vector.broadcast %cst_2 : f32 to vector<13x1xf32>
    %c0_3 = arith.constant 0 : index
    %c0_4 = arith.constant 0 : index
    %5 = vector.load %arg4[%c0_3, %c0_4] : memref<13x1xf32, #tpu.memory_space<vmem>>, vector<13x1xf32>
    tpu.vector_store %arg4[%c0_3, %c0_4], %4 {strides = array<i32>} : memref<13x1xf32, #tpu.memory_space<vmem>>, vector<13x1xf32>,
    %c8 = arith.constant 8 : index
    %c0_5 = arith.constant 0 : index
    %6 = vector.load %arg4[%c8, %c0_5] : memref<13x1xf32, #tpu.memory_space<vmem>>, vector<4x1xf32>
    tpu.vector_store %arg4[%c8, %c0_5], %3 {strides = array<i32>} : memref<13x1xf32, #tpu.memory_space<vmem>>, vector<4x1xf32>,
    %cst_6 = arith.constant 0.000000e+00 : f32
    %7 = vector.broadcast %cst_6 : f32 to vector<4x1xf32>
    %c0_7 = arith.constant 0 : index
    %8 = memref.load %arg2[%c0_7] : memref<3xf32, #tpu.memory_space<smem>>
    %c7 = arith.constant 7 : index
    %c0_8 = arith.constant 0 : index
    %9 = vector.load %arg4[%c7, %c0_8] : memref<13x1xf32, #tpu.memory_space<vmem>>, vector<4x1xf32>
    %10 = vector.broadcast %8 : f32 to vector<4x1xf32>
    %11 = arith.mulf %10, %9 : vector<4x1xf32>
    %12 = arith.addf %7, %11 : vector<4x1xf32>
    %c1 = arith.constant 1 : index
    %13 = memref.load %arg2[%c1] : memref<3xf32, #tpu.memory_space<smem>>
    %c8_9 = arith.constant 8 : index
    %c0_10 = arith.constant 0 : index
    %14 = vector.load %arg4[%c8_9, %c0_10] : memref<13x1xf32, #tpu.memory_space<vmem>>, vector<4x1xf32>
    %15 = vector.broadcast %13 : f32 to vector<4x1xf32>
    %16 = arith.mulf %15, %14 : vector<4x1xf32>
    %17 = arith.addf %12, %16 : vector<4x1xf32>
    %c2 = arith.constant 2 : index
    %18 = memref.load %arg2[%c2] : memref<3xf32, #tpu.memory_space<smem>>
    %c9 = arith.constant 9 : index
    %c0_11 = arith.constant 0 : index
    %19 = vector.load %arg4[%c9, %c0_11] : memref<13x1xf32, #tpu.memory_space<vmem>>, vector<4x1xf32>
    %20 = vector.broadcast %18 : f32 to vector<4x1xf32>
    %21 = arith.mulf %20, %19 : vector<4x1xf32>
    %22 = arith.addf %17, %21 : vector<4x1xf32>
    %23 = arith.negf %22 : vector<4x1xf32>
    %24 = math.exp %23 : vector<4x1xf32>
    %cst_12 = arith.constant 1.000000e+00 : f32
    %25 = vector.broadcast %cst_12 : f32 to vector<4x1xf32>
    %26 = arith.addf %25, %24 : vector<4x1xf32>
    %27 = arith.divf %25, %26 : vector<4x1xf32>
    %28 = vector.broadcast %27 : vector<4x1xf32> to vector<4x256xf32>
    %29 = arith.mulf %1, %28 : vector<4x256xf32>
    %c0_13 = arith.constant 0 : index
    %c0_14 = arith.constant 0 : index
    %c0_15 = arith.constant 0 : index
    %30 = vector.load %arg3[%c0_13, %c0_14, %c0_15] : memref<1x4x256xf32, #tpu.memory_space<vmem>>, vector<1x4x256xf32>
    %31 = vector.shape_cast %30 : vector<1x4x256xf32> to vector<4x256xf32>
    %32 = vector.shape_cast %29 : vector<4x256xf32> to vector<1x4x256xf32>
    tpu.vector_store %arg3[%c0_13, %c0_14, %c0_15], %32 {strides = array<i32>} : memref<1x4x256xf32, #tpu.memory_space<vmem>>, vector<1x4x256xf32>,
    return
  }
  func.func @transform_0(%arg0: i32) -> (i32, i32, i32) {
    %c0_i32 = arith.constant 0 : i32
    %c0_i32_0 = arith.constant 0 : i32
    %c0_i32_1 = arith.constant 0 : i32
    return %arg0, %c0_i32, %c0_i32_0 : i32, i32, i32
  }
  func.func @transform_1(%arg0: i32) -> i32 {
    %c0_i32 = arith.constant 0 : i32
    %c0_i32_0 = arith.constant 0 : i32
    return %c0_i32 : i32
  }
  func.func @transform_2(%arg0: i32) -> (i32, i32, i32) {
    %c0_i32 = arith.constant 0 : i32
    %c0_i32_0 = arith.constant 0 : i32
    %c0_i32_1 = arith.constant 0 : i32
    return %arg0, %c0_i32, %c0_i32_0 : i32, i32, i32
  }
}

</mosaic_0001>

<bundles_post_ra>
// kernel: tpu_custom_call.1
= control target key start
LH: loop header
LB: loop body
LE: loop exit
PB: predicated region body
PF: predicated region fallthrough
CT: control target
= control target key end

     0   :  { %7 = vsyncpa [#allocation4], 0  ;;  %s713_s0 = inlined_call_operand.hbm [shape: f32[2,4,256], index: 0, kind: input, shape index: {}]   ;;  %s714_s1 = inlined_call_operand.vmem [shape: f32[3], index: 1, kind: input, shape index: {}]   ;;  %s715_s2 = inlined_call_operand.hbm [shape: f32[2,4,256], index: 2, kind: output, shape index: {}]  }
   0x1   :  { %9 = vsyncpa [#allocation4 + $0x1], 0 }
   0x2   :  { %10 = vsyncpa [#allocation6], 0 }
   0x3   :  { %11 = vsyncpa [#allocation5], 0 }
   0x4   :  { %13 = vsyncpa [#allocation5 + $0x1], 0  ;;  %s543_s9 = smov 0   ;;  %s545_s10 = smov 0  }
   0x5   :  { %s547_s11 = smov 0   ;;  %s549_s12 = smov 0  }
   0x6 LB: > { %s564_s13 = sadd.s32 4294967295, %s520_s12   ;;  %s322_s14 = sadd.s32 4294967294, %s520_s12   ;;  %s520_s12 = sphi %s549_s12, %s738_s12   ;;  %s516_s11 = sphi %s547_s11, %s737_s11   ;;  %s512_s10 = sphi %s545_s10, %s736_s10   ;;  %s508_s9 = sphi %s543_s9, %s735_s9  }
   0x7   : > { %p39_p0 = scmp.ne.s32.totalorder %s512_s10, %s508_s9  ;;  %p716_p1 = scmp.eq.s32.totalorder %s564_s13, 0 }
   0x8   : > { %p90_p3 = scmp.eq.s32.totalorder %s322_s14, 1  ;;  %p323_p5 = scmp.ge.s32.totalorder %s520_s12, 1 }
   0x9   : > { %p573_p4 = por %p716_p1, %p39_p0  ;;  %p97_p7 = scmp.lt.s32.totalorder %s520_s12, 3 }
   0xa   : > { %p578_p6 = por %p90_p3, %p39_p0  ;;  %s110_s19 = sshll.u32 %s714_s1, 4  ;;  %s111_s19 = int_to_ptr.vmem [resolvable:$true] %s110_s19 }
   0xb   : > { %s720_s15 = scalar_select %p573_p4, 1, 0 }
   0xc   : > { %s721_s16 = scalar_select %p578_p6, 1, 0 }
   0xd   : > { %p586_p8 = pnand %p323_p5, %p97_p7  ;;  %s594_s21 = sadd.s32 1, %s520_s12  }
   0xe   : > { %s23_s23 = ssub.s32 %s520_s12, %s594_s21  ;;  %s26_s25 = sadd.s32 1, %s516_s11 }
   0xf   : > { %s722_s20 = scalar_select %p586_p8, 1, 0 }
  0x10   : > { %p351_p10 = pneg %p586_p8  ;;  %p604_p12 = scmp.eq.s32.totalorder %s23_s23, 0 }
  0x11   : > { %p33_p13 = scmp.ne.s32.totalorder %s516_s11, %s512_s10  ;;  %s409_s26 = scalar_lea.vmem %s111_s19, 16 }
  0x12   : > { %p598_p11 = pnand %p351_p10, %p716_p1  ;;  %p410_p0 = scmp.ne.s32.totalorder %s111_s19, %s409_s26 }
  0x13   : > { %p417_p9 = scmp.lt.s32.totalorder %s111_s19, %s111_s19  ;;  %p418_p2 = scmp.lt.s32.totalorder %s409_s26, %s409_s26 }
  0x14   : > { %p411_p3 = pneg %p598_p11 }
  0x15   : > { %p419_p10 = por %p418_p2, %p417_p9 }
  0x16   : > { %p412_p5 = pnand %p411_p3, %p410_p0 }
  0x18   : > { %p413_p7 = pneg %p412_p5 }
  0x1a   : > { %p420_p1 = pnand %p419_p10, %p413_p7 }
  0x1c   : > { %423 = shalt.err (!%p420_p1)
}
  0x1d   : > { %s522_s27 = smov [#allocation7]   ;;  %p34_p2 = scmp.eq.s32.totalorder %s520_s12, 0 }
  0x1e   : > { %354 = dma.vmem_to_smem (!%p598_p11), %s111_s19, 16, %s522_s27, [#allocation6]  }
  0x1f   : > { %s618_s28 = scalar_select %p604_p12, %s516_s11, %s26_s25  }
  0x20   : > { %p725_p1 = scmp.eq.s32.totalorder %s564_s13, 1  ;;  %p364_p0 = scmp.lt.s32.totalorder %s520_s12, 2 }
  0x21   : > { %s121_s30 = sand.u32 1, %s516_s11   ;;  %p35_p3 = por %p34_p2, %p33_p13 }
  0x22   : > { %p626_p9 = por %p725_p1, %p33_p13  ;;  %s326_s3 = sshll.u32 %s121_s30, 3 }
  0x23   : > { %s341_s4 = sshll.u32 %s520_s12, 7  ;;  %s125_s8 = scalar_lea.vmem [#allocation3], %s326_s3 }
  0x24   : > { %s726_s29 = scalar_select %p626_p9, 1, 0 }
  0x25   : > { %s639_s7 = scalar_lea.hbm %s713_s0, %s341_s4  ;;  %s133_s14 = sshll.u32 %s125_s8, 4  ;;  %s134_s14 = int_to_ptr.vmem [resolvable:$true] %s133_s14 }
  0x26   : > { %p641_p11 = pnand %p364_p0, %p35_p3  ;;  %s122_s18 = scalar_lea.sflag [#allocation4], %s121_s30 }
  0x27   : > { %s424_s19 = scalar_lea.hbm %s639_s7, 128  ;;  %s429_s24 = scalar_lea.hbm %s713_s0, 256 }
  0x28   : > { %p425_p12 = scmp.ne.s32.totalorder %s639_s7, %s424_s19  ;;  %p426_p13 = pneg %p641_p11 }
  0x29   : > { %p430_p10 = scmp.lt.s32.totalorder %s639_s7, %s713_s0  ;;  %p431_p2 = scmp.lt.s32.totalorder %s429_s24, %s424_s19 }
  0x2a   : > { %p427_p5 = pnand %p426_p13, %p425_p12 }
  0x2b   : > { %p432_p1 = por %p431_p2, %p430_p10 }
  0x2c   : > { %p428_p7 = pneg %p427_p5 }
  0x2e   : > { %p433_p0 = pnand %p432_p1, %p428_p7 }
  0x30   : > { %436 = shalt.err (!%p433_p0)
}
  0x31   : > { %s437_s27 = scalar_lea.vmem %s134_s14, 128  ;;  %s523_s30 = smov [#allocation3]  }
  0x32   : > { %p438_p3 = scmp.ne.s32.totalorder %s134_s14, %s437_s27  ;;  %s442_s3 = sshll.u32 %s523_s30, 4  ;;  %s443_s3 = int_to_ptr.vmem [resolvable:$false] %s442_s3 }
  0x33   : > { %s444_s4 = scalar_lea.vmem %s443_s3, 256  ;;  %p445_p12 = scmp.lt.s32.totalorder %s134_s14, %s443_s3 }
  0x34   : > { %p440_p6 = pnand %p438_p3, %p426_p13  ;;  %p446_p5 = scmp.lt.s32.totalorder %s444_s4, %s437_s27 }
  0x36   : > { %p441_p9 = pneg %p440_p6  ;;  %p447_p4 = por %p446_p5, %p445_p12 }
  0x38   : > { %p448_p8 = pnand %p447_p4, %p441_p9 }
  0x3a   : > { %451 = shalt.err (!%p448_p8)
}
  0x3b   : > { %358 = dma.hbm_to_vmem [thread:$0]  (!%p641_p11), %s639_s7, 128, %s134_s14, %s122_s18  }
  0x3c   : > { %p728_p7 = scmp.ne.s32.totalorder %s722_s20, 0 }
  0x3d   : > { %s662_s5 = sand.u32 (!%p728_p7), 1, %s512_s10   ;;  %p729_p4 = scmp.ne.s32.totalorder (!%p728_p7), %s720_s15, 0 }
  0x3e   : > { %142 = sbr.rel (%p728_p7) target bundleno = 406 (0x196), region = 28  ;;  %s330_s6 = sshll.u32 (!%p728_p7), %s662_s5, 3 }
  0x3f   : > { %s145_s8 = scalar_lea.sflag (!%p728_p7), [#allocation4], %s662_s5  ;;  %s148_s19 = scalar_lea.vmem (!%p728_p7), [#allocation3], %s330_s6 }
  0x43   : > { %495 = dma.done.wait (%p729_p4), %s145_s8, 128  }
  0x44   : > { %497 = vsyncadd (%p729_p4), %s145_s8, 4294967168  ;;  %p730_p6 = scmp.eq.s32.totalorder %s564_s13, 0 }
  0x46   : > { %499 = dma.done.wait (%p730_p6), [#allocation6], 16   ;;  %p731_p8 = pmov %p730_p6 }
  0x48   : > { %501 = vsyncadd (%p731_p8), [#allocation6], 4294967280 }
  0x49   : > { %157 = sfence }
  0x4a   : > { %v174_v0 = vld [vmem:[%s148_s19] sm:$0xff]  ;;  %vm178_vm0 = vcmask 1043456   ;;  %vm184_vm1 = vcmask 7168   ;;  %vm186_vm2 = vcmask 4096   ;;  %v524_v3 = vmov 0.0   ;;  %s190_s15 = sld [smem:[#allocation7]] }
  0x4b   : > { %v176_v1 = vcombine.high %v174_v0, %v174_v0  ;;  %v179_v2 = vsel %vm178_vm0, %v174_v0, 0.0  ;;  %185 = vst.msk [vmem:[#allocation2] sm:$0xff] %vm184_vm1, %v524_v3  ;;  %v525_v6 = vmov 0   ;;  %vm188_vm3 = vcmask 3072   ;;  %s333_s20 = sld [smem:[#allocation7 + $0x1]]  ;;  %s342_s14 = sshll.u32 %s564_s13, 7 }
  0x4c   : > { %187 = vst.msk [vmem:[#allocation2 + $0x8] sm:$0x1f] %vm186_vm2, %v524_v3  ;;  %403 = vset.pattern.permute.xlu0 %v525_v6  ;;  %s334_s7 = sld [smem:[#allocation7 + $0x2]]  ;;  %v526_v23 = vmov 839922192   ;;  %v218_v25 = vlaneseq  ;;  %s173_s17 = scalar_lea.vmem [#allocation8], %s330_s6 }
  0x4d   : > { %v180_v4 = vsel %vm178_vm0, %v176_v1, 0.0  ;;  %v216_v24 = vunpack.c.l.s4 %v526_v23  ;;  %s240_s18 = sshll.u32 %s173_s17, 4  ;;  %s238_s24 = scalar_lea.hbm %s715_s2, %s342_s14  ;;  %s241_s18 = int_to_ptr.vmem [resolvable:$true] %s240_s18 }
  0x4e   : > { %v181_v5 = vadd.f32 %v180_v4, %v179_v2  ;;  %v219_v27 = vshrl.u32 %v218_v25, 7  ;;  %s226_s25 = scalar_lea.sflag [#allocation5], %s662_s5  ;;  %s452_s26 = scalar_lea.vmem %s241_s18, 128 }
  0x4f   : > { %v217_v26 = vunpack.c.0.s8 %v216_v24  ;;  %p453_p9 = scmp.ne.s32.totalorder %s241_s18, %s452_s26  ;;  %p732_p11 = scmp.ne.s32.totalorder %s726_s29, 0 }
  0x50   : > { %182 = vadd.xlane.f32.xlu0 %v181_v5  ;;  %v192_v8 = vstv %s190_s15  ;;  %s527_s27 = smov [#allocation8]  }
  0x51   : > { %v197_v9 = vstv %s333_s20  ;;  %v220_v28 = vsub.s32 %v217_v26, %v219_v27  ;;  %p454_p13 = pnand %p453_p9, %p732_p11  ;;  %s456_s30 = sshll.u32 %s527_s27, 4  ;;  %s457_s30 = int_to_ptr.vmem [resolvable:$false] %s456_s30 }
  0x52   : > { %v202_v10 = vstv %s334_s7  ;;  %s458_s13 = scalar_lea.vmem %s457_s30, 256  ;;  %p459_p2 = scmp.lt.s32.totalorder %s241_s18, %s457_s30 }
  0x53   : > { %p455_p10 = pneg %p454_p13  ;;  %p460_p1 = scmp.lt.s32.totalorder %s458_s13, %s452_s26 }
  0x55   : > { %p461_p0 = por %p460_p1, %p459_p2 }
  0x57   : > { %p462_p3 = pnand %p461_p0, %p455_p10 }
  0xd9   : > { %v183_v7 = vpop.xlane.xlu0 %182 }
  0xda   : > { %189 = vst.msk [vmem:[#allocation2 + $0x8] sm:$0xf] %vm188_vm3, %v183_v7 }
  0xe1   : > { %v191_v11 = vld [vmem:[#allocation2 + $0x7] sm:$0xf] }
  0xe2   : > { %v196_v12 = vld [vmem:[#allocation2 + $0x8] sm:$0xf]  ;;  %v193_v14 = vmul.f32 %v192_v8, %v191_v11 }
  0xe3   : > { %v201_v13 = vld [vmem:[#allocation2 + $0x9] sm:$0xf]  ;;  %v198_v15 = vmul.f32 %v197_v9, %v196_v12 }
  0xe4   : > { %v203_v17 = vmul.f32 %v202_v10, %v201_v13 }
  0xe5   : > { %v199_v16 = vadd.f32 %v198_v15, %v193_v14 }
  0xe7   : > { %v204_v18 = vadd.f32 %v203_v17, %v199_v16 }
  0xe9   : > { %v335_v19 = vmul.f32 -1.442695, %v204_v18 }
  0xeb   : > { %405 = vpow2.f32 %v335_v19 }
  0xf8   : > { %v406_v20 = vpop.eup %405 }
  0xf9   : > { %v208_v21 = vadd.f32 1.0, %v406_v20 }
  0xfb   : > { %407 = vrcp.f32 %v208_v21 }
 0x108   : > { %v408_v22 = vpop.eup %407 }
 0x109   : > { %213 = vperm.xlu0 %403, %v408_v22  }
 0x184   : > { %v214_v29 = vpop.permute.xlu0 %213 }
 0x185   : > { %v221_v30 = vrot.slane %v214_v29, %v220_v28 }
 0x187   : > { %v223_v31 = vmul.f32 %v221_v30, %v174_v0 }
 0x189   : > { %224 = vst [vmem:[%s173_s17] sm:$0xff] %v223_v31 }
 0x18a   : > { %465 = shalt.err (!%p462_p3)
}
 0x18b   : > { %s466_s3 = scalar_lea.hbm %s238_s24, 128  ;;  %s470_s6 = scalar_lea.hbm %s715_s2, 256 }
 0x18c   : > { %p467_p12 = scmp.ne.s32.totalorder %s238_s24, %s466_s3  ;;  %p471_p4 = scmp.lt.s32.totalorder %s238_s24, %s715_s2 }
 0x18d   : > { %p472_p6 = scmp.lt.s32.totalorder %s470_s6, %s466_s3 }
 0x18e   : > { %p468_p5 = pnand %p467_p12, %p732_p11 }
 0x18f   : > { %p473_p8 = por %p472_p6, %p471_p4 }
 0x190   : > { %p469_p7 = pneg %p468_p5 }
 0x192   : > { %p474_p9 = pnand %p473_p8, %p469_p7 }
 0x194   : > { %477 = shalt.err (!%p474_p9)
}
 0x195   : > { %349 = dma.vmem_to_hbm [thread:$0]  (%p732_p11), %s241_s18, 128, %s238_s24, %s226_s25  }
 0x196 PF: > { %s252_s15 = sand.u32 1, %s508_s9   ;;  %p733_p13 = scmp.ne.s32.totalorder %s721_s16, 0 }
 0x197   : > { %p734_p10 = scmp.ge.s32.totalorder %s520_s12, 2  ;;  %s253_s20 = scalar_lea.sflag [#allocation5], %s252_s15 }
 0x199   : > { %p360_p2 = pnand %p734_p10, %p733_p13 }
 0x19b   : > { %p361_p1 = pneg %p360_p2 }
 0x19d   : > { %503 = dma.done.wait (%p361_p1), %s253_s20, 128  }
 0x19e   : > { %505 = vsyncadd (%p361_p1), %s253_s20, 4294967168  ;;  %p16_p0 = scmp.ge.s32.totalorder %s594_s21, 4   ;;  %s735_s9 = smov %s512_s10 }
 0x19f   : > { %s736_s10 = smov %s516_s11  ;;  %s737_s11 = smov %s618_s28 }
 0x1a0   : > { %s738_s12 = smov %s594_s21  ;;  %18 = sbr.rel (!%p16_p0) target bundleno = 6 (0x6), region = 78 }
 0x1a5   :  { %258 = vsyncpa [#allocation4], 1 }
 0x1a6   :  { %260 = vsyncpa [#allocation4 + $0x1], 1 }
 0x1a7   :  { %261 = vsyncpa [#allocation5], 1 }
 0x1a8   :  { %263 = vsyncpa [#allocation5 + $0x1], 1 }
 0x1a9   :  { %264 = vsyncpa [#allocation6], 1 }
 0x1aa   :  { %266 = vsyncpa [#allocation6 + $0x1], 1 }

</bundles_post_ra>
